<compile_context>
chip_gen: v7x
topology: tpu7x:2x2x1
jax: 0.10.0
libtpu: 0.0.40
codegen_flags: <defaults>
</compile_context>

<pallas_src>
import jax
import jax.numpy as jnp
from jax.experimental import pallas as pl
from jax.experimental.pallas import tpu as pltpu


def _cdiv(a, b):
    return (a + b - 1) // b


def _round_up(n, m):
    return _cdiv(n, m) * m


def mlp_kernel(x_ref, w1_ref, b1_ref, w2_ref, b2_ref, o_ref):
    """One batch tile of the 2-layer MLP.

    x_ref : (TB, D_in) f32  activation tile (streamed per grid step)
    w1_ref: (D_in, H)  f32  layer-1 weight, pre-transposed, VMEM-resident
    b1_ref: (1, H)     f32  layer-1 bias
    w2_ref: (H, 1)     f32  layer-2 weight as a column, VMEM-resident
    b2_ref: (1, 1)     f32  layer-2 bias (SMEM scalar)
    o_ref : (TB, 1)    f32  output tile
    """
    # Layer 1 on the MXU, f32 accumulation; bias + ReLU on the VPU.
    h = jnp.dot(x_ref[...], w1_ref[...], preferred_element_type=jnp.float32)
    h = jnp.maximum(h + b1_ref[...], 0.0)
    # Layer 2 also on the MXU (N=1): avoids the XLU cross-lane reduction tree
    # that was the saturating slot at these shapes.
    y = jnp.dot(h, w2_ref[...], preferred_element_type=jnp.float32)
    o_ref[...] = (y + b2_ref[0, 0]).astype(o_ref.dtype)


def exchange_rate_predictor(x, w1, b1, w2, b2, *, block_batch=4096):
    """Forward pass of ExchangeRatePredictor (PyTorch nn.Linear weight shapes).

    x : (B, D_in) f32
    w1: (H, D_in) f32   -- layer1.weight
    b1: (H,)      f32   -- layer1.bias
    w2: (1, H)    f32   -- layer2.weight
    b2: (1,)      f32   -- layer2.bias
    returns (B, 1) f32
    """
    B, d_in = x.shape
    H = w1.shape[0]

    w1_t = jnp.transpose(w1).astype(jnp.float32)            # (D_in, H)
    b1_r = b1.reshape(1, H).astype(jnp.float32)
    w2_c = jnp.transpose(w2).astype(jnp.float32)             # (H, 1)
    b2_r = b2.reshape(1, 1).astype(jnp.float32)

    # Batch tiling:
    #  * small B  -> a single block (these calls are fixed-cost bound anyway);
    #  * large B  -> an even number of balanced tiles (multiple of 128 rows)
    #    so the "parallel" grid axis splits evenly across v7x's 2 TensorCores
    #    and per-grid-step overhead is amortized over big tiles.
    if B <= block_batch:
        n_tiles = 1
        tb = _round_up(B, 8)
    else:
        n_tiles = _round_up(_cdiv(B, block_batch), 2)        # even tile count
        tb = _round_up(_cdiv(B, n_tiles), 128)                # balanced tiles
    b_pad = tb * n_tiles
    x_in = jnp.pad(x, ((0, b_pad - B), (0, 0))) if b_pad != B else x

    cost = pl.CostEstimate(
        flops=2 * b_pad * d_in * H        # layer-1 matmul
        + 2 * b_pad * H                   # bias + relu
        + 2 * b_pad * H                   # layer-2 matmul
        + b_pad,                          # layer-2 bias
        transcendentals=0,
        bytes_accessed=(b_pad * d_in * 4  # x
                        + d_in * H * 4    # w1
                        + H * 4 + H * 4 + 4   # b1, w2, b2
                        + b_pad * 4),     # y
    )

    out = pl.pallas_call(
        mlp_kernel,
        out_shape=jax.ShapeDtypeStruct((b_pad, 1), jnp.float32),
        grid=(n_tiles,),
        in_specs=[
            pl.BlockSpec((tb, d_in), lambda i: (i, 0)),       # x: streamed
            pl.BlockSpec((d_in, H), lambda i: (0, 0)),        # w1: resident
            pl.BlockSpec((1, H), lambda i: (0, 0)),           # b1: resident
            pl.BlockSpec((H, 1), lambda i: (0, 0)),           # w2 col: resident
            pl.BlockSpec(memory_space=pltpu.MemorySpace.SMEM),  # b2 scalar
        ],
        out_specs=pl.BlockSpec((tb, 1), lambda i: (i, 0)),
        compiler_params=pltpu.CompilerParams(
            # Batch tiles are independent -> shard across both TCs on v7x;
            # near-neutral (but harmless) on single-TC v5e/v6e.
            dimension_semantics=("parallel",),
        ),
        cost_estimate=cost,
    )(x_in, w1_t, b1_r, w2_c, b2_r)

    # Padded rows compute relu(b1)·w2 + b2 garbage; slice them off.
    return out[:B]


if __name__ == "__main__":
    input_size = 16
    hidden_size = 64

    key = jax.random.PRNGKey(0)
    kx1, kx2, kw1, kb1, kw2, kb2 = jax.random.split(key, 6)

    # Deterministic parameters in PyTorch nn.Linear layouts.
    w1 = jax.random.normal(kw1, (hidden_size, input_size), jnp.float32) * 0.1
    b1 = jax.random.normal(kb1, (hidden_size,), jnp.float32) * 0.1
    w2 = jax.random.normal(kw2, (1, hidden_size), jnp.float32) * 0.1
    b2 = jax.random.normal(kb2, (1,), jnp.float32) * 0.1

    def reference(x):
        h = jnp.dot(x, jnp.transpose(w1)) + b1.reshape(1, -1)
        h = jnp.maximum(h, 0.0)
        return jnp.dot(h, jnp.transpose(w2)) + b2.reshape(1, 1)

    # batch=8: single-block path; batch=2500: multi-tile grid (2 balanced
    # tiles of 1280 rows) + batch padding.
    for batch, kx in ((8, kx1), (2500, kx2)):
        x = jax.random.normal(kx, (batch, input_size), dtype=jnp.float32)

        y = exchange_rate_predictor(x, w1, b1, w2, b2)
        y = jax.block_until_ready(y)
        assert y.shape == (batch, 1)

        y_ref = reference(x)
        assert jnp.allclose(y, y_ref, atol=1e-3, rtol=1e-3), \
            f"mismatch vs f32 reference (batch={batch})"

    print("KERNEL_OK")
</pallas_src>

<mosaic_0001>
module attributes {stable_mosaic.version = 11 : i64} {
  func.func @mlp_kernel(%arg0: i32, %arg1: memref<8x16xf32, #tpu.memory_space<vmem>>, %arg2: memref<16x64xf32, #tpu.memory_space<vmem>>, %arg3: memref<1x64xf32, #tpu.memory_space<vmem>>, %arg4: memref<64x1xf32, #tpu.memory_space<vmem>>, %arg5: memref<1x1xf32, #tpu.memory_space<smem>>, %arg6: memref<8x1xf32, #tpu.memory_space<vmem>>) attributes {dimension_semantics = [#tpu.dimension_semantics<parallel>], iteration_bounds = array<i64: 1>, scalar_prefetch = 0 : i64, scratch_operands = 0 : i64, tpu.core_type = #tpu.core_type<tc>, window_params = [{transform_indices = @transform_0, window_bounds = array<i64: 8, 16>}, {pipeline_mode = #tpu.pipeline_mode<synchronous>, transform_indices = @transform_1, window_bounds = array<i64: 16, 64>}, {pipeline_mode = #tpu.pipeline_mode<synchronous>, transform_indices = @transform_2, window_bounds = array<i64: 1, 64>}, {pipeline_mode = #tpu.pipeline_mode<synchronous>, transform_indices = @transform_3, window_bounds = array<i64: 64, 1>}, {transform_indices = @transform_4, window_bounds = array<i64: 1, 1>}, {transform_indices = @transform_5, window_bounds = array<i64: 8, 1>}]} {
    %c0 = arith.constant 0 : index
    %c0_0 = arith.constant 0 : index
    %0 = vector.load %arg1[%c0, %c0_0] : memref<8x16xf32, #tpu.memory_space<vmem>>, vector<8x16xf32>
    %c0_1 = arith.constant 0 : index
    %c0_2 = arith.constant 0 : index
    %1 = vector.load %arg2[%c0_1, %c0_2] : memref<16x64xf32, #tpu.memory_space<vmem>>, vector<16x64xf32>
    %cst = arith.constant dense<0.000000e+00> : vector<8x64xf32>
    %2 = tpu.matmul %0, %1, %cst {dimension_numbers = #tpu.dot_dimension_numbers<[1], [0], [0], [1], [0, 0, 1, 1], [], []>} : vector<8x16xf32>, vector<16x64xf32>, vector<8x64xf32> -> vector<8x64xf32>
    %c0_3 = arith.constant 0 : index
    %c0_4 = arith.constant 0 : index
    %3 = vector.load %arg3[%c0_3, %c0_4] : memref<1x64xf32, #tpu.memory_space<vmem>>, vector<1x64xf32>
    %4 = vector.broadcast %3 : vector<1x64xf32> to vector<8x64xf32>
    %5 = arith.addf %2, %4 : vector<8x64xf32>
    %cst_5 = arith.constant 0.000000e+00 : f32
    %6 = vector.broadcast %cst_5 : f32 to vector<8x64xf32>
    %7 = arith.maximumf %5, %6 : vector<8x64xf32>
    %c0_6 = arith.constant 0 : index
    %c0_7 = arith.constant 0 : index
    %8 = vector.load %arg4[%c0_6, %c0_7] : memref<64x1xf32, #tpu.memory_space<vmem>>, vector<64x1xf32>
    %cst_8 = arith.constant dense<0.000000e+00> : vector<8x1xf32>
    %9 = tpu.matmul %7, %8, %cst_8 {dimension_numbers = #tpu.dot_dimension_numbers<[1], [0], [0], [1], [0, 0, 1, 1], [], []>} : vector<8x64xf32>, vector<64x1xf32>, vector<8x1xf32> -> vector<8x1xf32>
    %c0_9 = arith.constant 0 : index
    %c0_10 = arith.constant 0 : index
    %10 = memref.load %arg5[%c0_9, %c0_10] : memref<1x1xf32, #tpu.memory_space<smem>>
    %11 = vector.broadcast %10 : f32 to vector<8x1xf32>
    %12 = arith.addf %9, %11 : vector<8x1xf32>
    %c0_11 = arith.constant 0 : index
    %c0_12 = arith.constant 0 : index
    %13 = vector.load %arg6[%c0_11, %c0_12] : memref<8x1xf32, #tpu.memory_space<vmem>>, vector<8x1xf32>
    tpu.vector_store %arg6[%c0_11, %c0_12], %12 {strides = array<i32>} : memref<8x1xf32, #tpu.memory_space<vmem>>, vector<8x1xf32>,
    return
  }
  func.func @transform_0(%arg0: i32) -> (i32, i32) {
    %c0_i32 = arith.constant 0 : i32
    %c0_i32_0 = arith.constant 0 : i32
    return %arg0, %c0_i32 : i32, i32
  }
  func.func @transform_1(%arg0: i32) -> (i32, i32) {
    %c0_i32 = arith.constant 0 : i32
    %c0_i32_0 = arith.constant 0 : i32
    %c0_i32_1 = arith.constant 0 : i32
    return %c0_i32, %c0_i32_0 : i32, i32
  }
  func.func @transform_2(%arg0: i32) -> (i32, i32) {
    %c0_i32 = arith.constant 0 : i32
    %c0_i32_0 = arith.constant 0 : i32
    %c0_i32_1 = arith.constant 0 : i32
    return %c0_i32, %c0_i32_0 : i32, i32
  }
  func.func @transform_3(%arg0: i32) -> (i32, i32) {
    %c0_i32 = arith.constant 0 : i32
    %c0_i32_0 = arith.constant 0 : i32
    %c0_i32_1 = arith.constant 0 : i32
    return %c0_i32, %c0_i32_0 : i32, i32
  }
  func.func @transform_4(%arg0: i32) -> (i32, i32) {
    %c0_i32 = arith.constant 0 : i32
    %c0_i32_0 = arith.constant 0 : i32
    %c0_i32_1 = arith.constant 0 : i32
    return %c0_i32, %c0_i32_0 : i32, i32
  }
  func.func @transform_5(%arg0: i32) -> (i32, i32) {
    %c0_i32 = arith.constant 0 : i32
    %c0_i32_0 = arith.constant 0 : i32
    return %arg0, %c0_i32 : i32, i32
  }
}

</mosaic_0001>

<bundles_post_ra>
// kernel: tpu_custom_call.1
= control target key start
LH: loop header
LB: loop body
LE: loop exit
PB: predicated region body
PF: predicated region fallthrough
CT: control target
= control target key end

     0   :  { %v255_v0 = vmov 0.0|0.0   ;;  %vm256_vm0 = vmmov 0   ;;  %v257_v3 = vmov 0.0   ;;  %vm31_vm1 = vcmask 130048   ;;  %s330_s1 = inlined_call_operand.vmem [shape: f32[16,64], index: 1, kind: input, shape index: {}]   ;;  %s331_s3 = inlined_call_operand.vmem [shape: f32[64,1], index: 3, kind: input, shape index: {}]   ;;  %s332_s0 = inlined_call_operand.vmem [shape: f32[8,16], index: 0, kind: input, shape index: {}]   ;;  %s333_s2 = inlined_call_operand.vmem [shape: f32[1,64], index: 2, kind: input, shape index: {}]   ;;  %s334_s4 = inlined_call_operand.<no memory space> [shape: f32[1,1], index: 4, kind: input, shape index: {}]   ;;  %s335_s5 = inlined_call_operand.vmem [shape: f32[8,1], index: 5, kind: output, shape index: {}]  }
   0x1   :  { %237 = vmatprep.subr.bf16.mxu0 %v255_v0  ;;  %v22_v1 = vld [vmem:[%s330_s1] sm:$0xff]  ;;  %v23_v2 = vld [vmem:[%s330_s1 + $0x8] sm:$0xff]  ;;  %215 = vmatprep.mubr.msk.f32.mxu0 %vm256_vm0, %v257_v3  ;;  %v108_v7 = vld [vmem:[%s331_s3 + $0x10] sm:$0xff]  ;;  %vm116_vm2 = vcmask 523264   ;;  %v115_v23 = vstv %s334_s4  ;;  %vm190_vm3 = vcmask 7168  }
   0x2   :  { %v238_v4 = vpack.c.bf16 %v23_v2, %v22_v1  ;;  %240 = vmatprep.subr.bf16.mxu1 %v255_v0  ;;  %v106_v5 = vld [vmem:[%s331_s3] sm:$0xff]  ;;  %v107_v6 = vld [vmem:[%s331_s3 + $0x8] sm:$0xff]  ;;  %234 = vmatprep.mubr.msk.f32.mxu1 %vm256_vm0, %v257_v3  ;;  %v109_v9 = vld [vmem:[%s331_s3 + $0x18] sm:$0xff] }
   0x3   :  { %v241_v8 = vpack.c.bf16 %v107_v6, %v106_v5  ;;  %v21_v10 = vld [vmem:[%s332_s0] sm:$0xff]  ;;  %v244_v11 = vpack.c.bf16 %v109_v9, %v108_v7  ;;  %v111_v13 = vld [vmem:[%s331_s3 + $0x28] sm:$0xff]  ;;  %v112_v15 = vld [vmem:[%s331_s3 + $0x30] sm:$0xff] }
   0x4   :  { %239 = vmatpush3.bf16.msra.mxu0 %v238_v4  ;;  %v110_v12 = vld [vmem:[%s331_s3 + $0x20] sm:$0xff]  ;;  %v113_v16 = vld [vmem:[%s331_s3 + $0x38] sm:$0xff] }
   0x5   :  { %242 = vmatpush3.bf16.msra.mxu1 %v241_v8  ;;  %v247_v14 = vpack.c.bf16 %v111_v13, %v110_v12  ;;  %v250_v17 = vpack.c.bf16 %v113_v16, %v112_v15  ;;  %v196_v18 = vld [vmem:[%s333_s2] ss:$0 sm:$0xff] }
   0x6   :  { %243 = vmatprep.subr.bf16.mxu1 %v255_v0 }
   0x7   :  { %216 = vmatmul.mubr.msk.f32.vlgmr.msra.gmra.mrb[0].mxu0 %vm31_vm1, %v21_v10 }
   0x9   :  { %245 = vmatpush3.bf16.msra.mxu1 %v244_v11 }
   0xa   :  { %246 = vmatprep.subr.bf16.mxu1 %v255_v0 }
   0xd   :  { %248 = vmatpush3.bf16.msra.mxu1 %v247_v14 }
   0xe   :  { %249 = vmatprep.subr.bf16.mxu1 %v255_v0 }
  0x11   :  { %251 = vmatpush3.bf16.msra.mxu1 %v250_v17 }
  0xda   :  { %v101_v19 = vpop.f32.mrb[0].mxu0 }
  0xdb   :  { %v102_v20 = vadd.f32 %v196_v18, %v101_v19  ;;  %v217_v21 = vpop.f32.mrb[1].mxu0 }
  0xdd   :  { %v105_v22 = vmax.f32 %v102_v20, 0.0 }
  0xdf   :  { %235 = vmatmul.mubr.msk.f32.vlgmr.msra.gmra.mrb[0].mxu1 %vm116_vm2, %v105_v22 }
 0x1b2   :  { %v186_v24 = vpop.f32.mrb[0].mxu1 }
 0x1b3   :  { %v187_v25 = vadd.f32 %v186_v24, %v115_v23  ;;  %v236_v26 = vpop.f32.mrb[1].mxu1 }
 0x1b5   :  { %191 = vst.msk [vmem:[%s335_s5] sm:$0xff] %vm190_vm3, %v187_v25 }

</bundles_post_ra>
